<compile_context>
chip_gen: v6e
topology: v6e:2x2x1
jax: 0.10.0
libtpu: 0.0.40
codegen_flags: <defaults>
</compile_context>

<pallas_src>
import jax
import jax.numpy as jnp
from jax.experimental import pallas as pl
from jax.experimental.pallas import tpu as pltpu


def _round_up(v, m):
    return (v + m - 1) // m * m


def _pad2d(a, rows, cols):
    r, c = a.shape
    if r == rows and c == cols:
        return a
    return jnp.pad(a, ((0, rows - r), (0, cols - c)))


# ---------------------------------------------------------------------------
# Kernels
# ---------------------------------------------------------------------------

def _mlp_resident_kernel(x_ref, w1_ref, b1_ref, w2_ref, b2_ref, o_ref):
    """Small-batch path: no grid, every operand VMEM-resident."""
    # Weights are already bf16 (pre-cast in the wrapper).  Activations are
    # cast to bf16 only at the MXU inputs with f32 accumulation; bias-add and
    # ReLU stay f32 (v5e's VPU has no bf16).
    h = jnp.dot(x_ref[...].astype(jnp.bfloat16), w1_ref[...],
                preferred_element_type=jnp.float32)
    h = jnp.maximum(h + b1_ref[...], 0.0)
    y = jnp.dot(h.astype(jnp.bfloat16), w2_ref[...],
                preferred_element_type=jnp.float32)
    o_ref[...] = (y + b2_ref[...]).astype(o_ref.dtype)


def _mlp_tiled_kernel(x_ref, w1_ref, b1_ref, w2_ref, b2_ref, o_ref, acc_ref):
    """Large-batch path: grid = (N tiles ["parallel"], H tiles ["arbitrary"])."""
    k = pl.program_id(1)

    @pl.when(k == 0)
    def _():
        acc_ref[...] = jnp.zeros_like(acc_ref)

    h = jnp.dot(x_ref[...].astype(jnp.bfloat16), w1_ref[...],
                preferred_element_type=jnp.float32)
    h = jnp.maximum(h + b1_ref[...], 0.0)
    acc_ref[...] += jnp.dot(h.astype(jnp.bfloat16), w2_ref[...],
                            preferred_element_type=jnp.float32)

    @pl.when(k == pl.num_programs(1) - 1)
    def _():
        o_ref[...] = (acc_ref[...] + b2_ref[...]).astype(o_ref.dtype)


# ---------------------------------------------------------------------------
# Tiling / VMEM budgeting
# ---------------------------------------------------------------------------

def _vmem_capacity_bytes():
    try:
        return int(pltpu.get_tpu_info().vmem_capacity_bytes)
    except Exception:
        return 64 * 1024 * 1024   # conservative fallback (v7x per-core VMEM)


def _choose_tiles(vmem_budget, d_in_p, h_p, d_out_p, x_item, out_item):
    """Pick (block_h, h_tiles, max block_n) that fit the VMEM budget."""
    best = None
    for target_bh in (h_p, 4096, 2048, 1024, 512, 256, 128):
        if target_bh > h_p:
            continue
        h_tiles = pl.cdiv(h_p, target_bh)
        block_h = _round_up(pl.cdiv(h_p, h_tiles), 128)
        weight_bufs = 1 if h_tiles == 1 else 2      # invariant -> 1 buffer
        weight_bytes = (weight_bufs * (d_in_p * block_h * 2     # bf16 w1
                                       + block_h * d_out_p * 2  # bf16 w2
                                       + block_h * 4)           # f32 b1
                        + d_out_p * 4)                          # f32 b2
        per_row = (2 * d_in_p * x_item        # x block, double-buffered
                   + d_in_p * 2               # bf16 copy of x block
                   + 2 * d_out_p * out_item   # out block, double-buffered
                   + d_out_p * 4              # f32 accumulator scratch
                   + block_h * 6)             # f32 h + bf16 copy of h
        avail = vmem_budget - weight_bytes
        if avail < per_row * 8:
            continue
        block_n_cap = min(2048, (avail // per_row) // 8 * 8)
        best = (block_h, h_tiles, block_n_cap)
        if block_n_cap >= 256:
            break
    if best is None:
        # TODO(synk): pathologically large D_in/D_out would also need K/N
        # tiling of the weight matrices; fall back to the smallest H tile.
        best = (128, pl.cdiv(h_p, 128), 128)
    return best


# ---------------------------------------------------------------------------
# Wrapper
# ---------------------------------------------------------------------------

def two_layer_net(x, w1, b1, w2, b2):
    """relu(x @ w1 + b1) @ w2 + b2   (== TwoLayerNet.forward).

    x: (N, D_in); w1: (D_in, H)  [= linear1.weight.T]; b1: (1, H);
                  w2: (H, D_out) [= linear2.weight.T]; b2: (1, D_out).
    """
    N, D_in = x.shape
    H = w1.shape[1]
    D_out = w2.shape[1]
    out_dtype = x.dtype
    x_item = jnp.dtype(x.dtype).itemsize
    out_item = jnp.dtype(out_dtype).itemsize

    d_in_p = _round_up(D_in, 128)
    h_p = _round_up(H, 128)
    d_out_p = _round_up(D_out, 128)

    vmem_cap = _vmem_capacity_bytes()
    block_h, h_tiles, block_n_cap = _choose_tiles(
        int(0.75 * vmem_cap), d_in_p, h_p, d_out_p, x_item, out_item)
    h_p = block_h * h_tiles

    # Zero padding is exact for linear+ReLU+linear: padded D_in columns hit
    # zero weight rows, padded H units are relu(0 + 0) = 0 and hit zero w2
    # rows, padded D_out columns are sliced off below.
    w1_p = _pad2d(w1, d_in_p, h_p).astype(jnp.bfloat16)   # pre-cast ONCE
    b1_p = _pad2d(b1, 1, h_p)                              # biases stay f32
    w2_p = _pad2d(w2, h_p, d_out_p).astype(jnp.bfloat16)
    b2_p = _pad2d(b2, 1, d_out_p)

    flops = 2 * N * (D_in * H + H * D_out)
    weight_hbm = w1_p.size * 2 + w2_p.size * 2 + (h_p + d_out_p) * 4

    # ------------------------------------------------------------------ small
    if N <= 512 and h_tiles == 1:
        n_p = _round_up(N, 8)
        x_p = _pad2d(x, n_p, d_in_p)
        req = (n_p * d_in_p * (x_item + 2) + n_p * d_out_p * out_item
               + n_p * h_p * 6 + weight_hbm)
        vmem_limit = min(int(0.9 * vmem_cap),
                         max(32 << 20, int(req * 1.5) + (4 << 20)))
        vmem_spec = pl.BlockSpec(memory_space=pltpu.MemorySpace.VMEM)
        y_p = pl.pallas_call(
            _mlp_resident_kernel,
            out_shape=jax.ShapeDtypeStruct((n_p, d_out_p), out_dtype),
            in_specs=[vmem_spec] * 5,
            out_specs=vmem_spec,
            compiler_params=pltpu.CompilerParams(vmem_limit_bytes=vmem_limit),
            cost_estimate=pl.CostEstimate(
                flops=flops, transcendentals=0,
                bytes_accessed=n_p * d_in_p * x_item
                + n_p * d_out_p * out_item + weight_hbm),
        )(x_p, w1_p, b1_p, w2_p, b2_p)
        return y_p[:N, :D_out]

    # ------------------------------------------------------------------ tiled
    block_n = min(block_n_cap, _round_up(N, 8))
    n_tiles = pl.cdiv(N, block_n)
    if n_tiles == 1 and N > 512:
        n_tiles = 2                               # keep both v7x TCs busy
    block_n = _round_up(pl.cdiv(N, n_tiles), 8)   # soften the padded tail
    n_p = block_n * n_tiles
    x_p = _pad2d(x, n_p, d_in_p)

    weight_bufs = 1 if h_tiles == 1 else 2
    req = (2 * block_n * d_in_p * x_item + block_n * d_in_p * 2
           + 2 * block_n * d_out_p * out_item
           + block_n * d_out_p * 4
           + block_n * block_h * 6
           + weight_bufs * (d_in_p * block_h * 2 + block_h * d_out_p * 2
                            + block_h * 4)
           + d_out_p * 4)
    vmem_limit = min(int(0.9 * vmem_cap),
                     max(32 << 20, int(req * 1.5) + (4 << 20)))

    cost = pl.CostEstimate(
        flops=flops, transcendentals=0,
        bytes_accessed=n_p * d_in_p * x_item + n_p * d_out_p * out_item
        + weight_hbm * (1 if h_tiles == 1 else n_tiles))

    def _call(single_buffer_invariants):
        def inv_spec(shape, index_map):
            # Grid-invariant operand: double-buffering a constant block is
            # pure VMEM waste -> single buffer.
            if single_buffer_invariants:
                return pl.BlockSpec(shape, index_map,
                                    pipeline_mode=pl.Buffered(1))
            return pl.BlockSpec(shape, index_map)

        if h_tiles == 1:
            w1_spec = inv_spec((d_in_p, block_h), lambda i, k: (0, 0))
            b1_spec = inv_spec((1, block_h), lambda i, k: (0, 0))
            w2_spec = inv_spec((block_h, d_out_p), lambda i, k: (0, 0))
        else:
            w1_spec = pl.BlockSpec((d_in_p, block_h), lambda i, k: (0, k))
            b1_spec = pl.BlockSpec((1, block_h), lambda i, k: (0, k))
            w2_spec = pl.BlockSpec((block_h, d_out_p), lambda i, k: (k, 0))
        b2_spec = inv_spec((1, d_out_p), lambda i, k: (0, 0))

        return pl.pallas_call(
            _mlp_tiled_kernel,
            out_shape=jax.ShapeDtypeStruct((n_p, d_out_p), out_dtype),
            grid=(n_tiles, h_tiles),
            in_specs=[
                pl.BlockSpec((block_n, d_in_p), lambda i, k: (i, 0)),
                w1_spec, b1_spec, w2_spec, b2_spec,
            ],
            out_specs=pl.BlockSpec((block_n, d_out_p), lambda i, k: (i, 0)),
            scratch_shapes=[pltpu.VMEM((block_n, d_out_p), jnp.float32)],
            compiler_params=pltpu.CompilerParams(
                dimension_semantics=("parallel", "arbitrary"),
                vmem_limit_bytes=vmem_limit,
            ),
            cost_estimate=cost,
        )(x_p, w1_p, b1_p, w2_p, b2_p)

    try:
        y_p = _call(single_buffer_invariants=True)
    except Exception:
        # Fallback if this Pallas build rejects pl.Buffered(1) on
        # grid-invariant operands: use default double-buffering.
        y_p = _call(single_buffer_invariants=False)

    return y_p[:N, :D_out]


# ---------------------------------------------------------------------------
# Demo / self-test
# ---------------------------------------------------------------------------

if __name__ == "__main__":
    # Small shapes consistent with the module: N x D_in -> H -> D_out.
    N, D_in, H, D_out = 8, 32, 64, 16
    dtype = jnp.float32

    key = jax.random.PRNGKey(0)
    kx, kw1, kb1, kw2, kb2 = jax.random.split(key, 5)

    x = jax.random.normal(kx, (N, D_in), dtype=dtype)
    # Stored pre-transposed: w1 ~ (D_in, H) corresponds to linear1.weight.T.
    w1 = jax.random.normal(kw1, (D_in, H), dtype=dtype) * 0.1
    b1 = jax.random.normal(kb1, (1, H), dtype=dtype) * 0.1
    w2 = jax.random.normal(kw2, (H, D_out), dtype=dtype) * 0.1
    b2 = jax.random.normal(kb2, (1, D_out), dtype=dtype) * 0.1

    def ref(xv):
        return jnp.maximum(xv @ w1 + b1, 0.0) @ w2 + b2

    # Tolerance accounts for bf16 MXU operands (f32 accumulation); exact f32
    # parity with the PyTorch reference would need full-f32 matmuls.
    y = jax.block_until_ready(two_layer_net(x, w1, b1, w2, b2))
    assert y.shape == (N, D_out)
    assert jnp.allclose(y, ref(x), atol=3e-2, rtol=3e-2), "mismatch (small path)"

    # Tiled path: N > 512 -> >= 2 grid steps on the "parallel" batch axis.
    N_big = 1024
    x_big = jax.random.normal(jax.random.PRNGKey(1), (N_big, D_in), dtype=dtype)
    y_big = jax.block_until_ready(two_layer_net(x_big, w1, b1, w2, b2))
    assert y_big.shape == (N_big, D_out)
    assert jnp.allclose(y_big, ref(x_big), atol=3e-2, rtol=3e-2), \
        "mismatch (tiled path)"

    print("KERNEL_OK")
</pallas_src>

<mosaic_0001>
module attributes {stable_mosaic.version = 11 : i64} {
  func.func @_mlp_resident_kernel(%arg0: memref<8x128xf32, #tpu.memory_space<vmem>>, %arg1: memref<128x128xbf16, #tpu.memory_space<vmem>>, %arg2: memref<1x128xf32, #tpu.memory_space<vmem>>, %arg3: memref<128x128xbf16, #tpu.memory_space<vmem>>, %arg4: memref<1x128xf32, #tpu.memory_space<vmem>>, %arg5: memref<8x128xf32, #tpu.memory_space<vmem>>) attributes {dimension_semantics = [], scalar_prefetch = 0 : i64, scratch_operands = 0 : i64, tpu.core_type = #tpu.core_type<tc>} {
    %c0 = arith.constant 0 : index
    %c0_0 = arith.constant 0 : index
    %0 = vector.load %arg0[%c0, %c0_0] : memref<8x128xf32, #tpu.memory_space<vmem>>, vector<8x128xf32>
    %1 = arith.truncf %0 : vector<8x128xf32> to vector<8x128xbf16>
    %c0_1 = arith.constant 0 : index
    %c0_2 = arith.constant 0 : index
    %2 = vector.load %arg1[%c0_1, %c0_2] : memref<128x128xbf16, #tpu.memory_space<vmem>>, vector<128x128xbf16>
    %cst = arith.constant dense<0.000000e+00> : vector<8x128xf32>
    %3 = tpu.matmul %1, %2, %cst {dimension_numbers = #tpu.dot_dimension_numbers<[1], [0], [0], [1], [0, 0, 1, 1], [], []>} : vector<8x128xbf16>, vector<128x128xbf16>, vector<8x128xf32> -> vector<8x128xf32>
    %c0_3 = arith.constant 0 : index
    %c0_4 = arith.constant 0 : index
    %4 = vector.load %arg2[%c0_3, %c0_4] : memref<1x128xf32, #tpu.memory_space<vmem>>, vector<1x128xf32>
    %5 = vector.broadcast %4 : vector<1x128xf32> to vector<8x128xf32>
    %6 = arith.addf %3, %5 : vector<8x128xf32>
    %cst_5 = arith.constant 0.000000e+00 : f32
    %7 = vector.broadcast %cst_5 : f32 to vector<8x128xf32>
    %8 = arith.maximumf %6, %7 : vector<8x128xf32>
    %9 = arith.truncf %8 : vector<8x128xf32> to vector<8x128xbf16>
    %c0_6 = arith.constant 0 : index
    %c0_7 = arith.constant 0 : index
    %10 = vector.load %arg3[%c0_6, %c0_7] : memref<128x128xbf16, #tpu.memory_space<vmem>>, vector<128x128xbf16>
    %cst_8 = arith.constant dense<0.000000e+00> : vector<8x128xf32>
    %11 = tpu.matmul %9, %10, %cst_8 {dimension_numbers = #tpu.dot_dimension_numbers<[1], [0], [0], [1], [0, 0, 1, 1], [], []>} : vector<8x128xbf16>, vector<128x128xbf16>, vector<8x128xf32> -> vector<8x128xf32>
    %c0_9 = arith.constant 0 : index
    %c0_10 = arith.constant 0 : index
    %12 = vector.load %arg4[%c0_9, %c0_10] : memref<1x128xf32, #tpu.memory_space<vmem>>, vector<1x128xf32>
    %13 = vector.broadcast %12 : vector<1x128xf32> to vector<8x128xf32>
    %14 = arith.addf %11, %13 : vector<8x128xf32>
    %c0_11 = arith.constant 0 : index
    %c0_12 = arith.constant 0 : index
    %15 = vector.load %arg5[%c0_11, %c0_12] : memref<8x128xf32, #tpu.memory_space<vmem>>, vector<8x128xf32>
    tpu.vector_store %arg5[%c0_11, %c0_12], %14 {strides = array<i32>} : memref<8x128xf32, #tpu.memory_space<vmem>>, vector<8x128xf32>,
    return
  }
}

</mosaic_0001>

<bundles_post_ra>
// kernel: tpu_custom_call.1
= control target key start
LH: loop header
LB: loop body
LE: loop exit
PB: predicated region body
PF: predicated region fallthrough
CT: control target
= control target key end

     0   :  { %10 = vsyncpa [#allocation3], 0  ;;  %s546_s0 = inlined_call_operand.hbm [shape: f32[8,128], index: 0, kind: input, shape index: {}]   ;;  %s547_s1 = inlined_call_operand.hbm [shape: bf16[128,128], index: 1, kind: input, shape index: {}]   ;;  %s548_s2 = inlined_call_operand.vmem [shape: f32[1,128], index: 2, kind: input, shape index: {}]   ;;  %s549_s3 = inlined_call_operand.hbm [shape: bf16[128,128], index: 3, kind: input, shape index: {}]   ;;  %s550_s4 = inlined_call_operand.vmem [shape: f32[1,128], index: 4, kind: input, shape index: {}]   ;;  %s551_s5 = inlined_call_operand.hbm [shape: f32[8,128], index: 5, kind: output, shape index: {}]  }
   0x1   :  { %11 = vsyncpa [#allocation6], 0 }
   0x2   :  { %12 = vsyncpa [#allocation4], 0  ;;  %s490_s18 = smov [#allocation5]  }
   0x3   :  { %s28_s19 = sshll.u32 %s490_s18, 4  ;;  %s29_s19 = int_to_ptr.vmem [resolvable:$true] %s28_s19 }
   0x4   :  { %s412_s20 = scalar_lea.vmem %s29_s19, 1024  ;;  %p417_p1 = scmp.lt.s32.totalorder %s29_s19, %s29_s19 }
   0x5   :  { %p413_p0 = scmp.ne.s32.totalorder %s29_s19, %s412_s20  ;;  %p418_p2 = scmp.lt.s32.totalorder %s412_s20, %s412_s20 }
   0x7   :  { %p419_p3 = por %p418_p2, %p417_p1 }
   0x9   :  { %p420_p4 = pnand %p419_p3, %p413_p0 }
   0xb   :  { %423 = shalt.err (!%p420_p4)
}
   0xc   :  { %s491_s21 = smov 64   ;;  %s492_s22 = smov 4  }
   0xd   :  { %34 = dma.hbm_to_vmem [thread:$0]  %s547_s1, 1024, %s29_s19, [#allocation6], %s491_s21, %s491_s21, %s492_s22  }
   0xe   :  { %s493_s25 = smov [#allocation2]   ;;  %s494_s27 = smov [#allocation7]  }
   0xf   :  { %s19_s26 = sshll.u32 %s493_s25, 4  ;;  %s42_s28 = sshll.u32 %s494_s27, 4  ;;  %s20_s26 = int_to_ptr.vmem [resolvable:$true] %s19_s26  ;;  %s43_s28 = int_to_ptr.vmem [resolvable:$true] %s42_s28 }
  0x10   :  { %s432_s29 = scalar_lea.vmem %s20_s26, 128  ;;  %p437_p6 = scmp.lt.s32.totalorder %s20_s26, %s20_s26 }
  0x11   :  { %p433_p5 = scmp.ne.s32.totalorder %s20_s26, %s432_s29  ;;  %p438_p7 = scmp.lt.s32.totalorder %s432_s29, %s432_s29 }
  0x13   :  { %p439_p8 = por %p438_p7, %p437_p6 }
  0x15   :  { %p440_p9 = pnand %p439_p8, %p433_p5 }
  0x17   :  { %443 = shalt.err (!%p440_p9)
}
  0x18   :  { %22 = dma.hbm_to_vmem [thread:$0]  %s546_s0, 128, %s20_s26, [#allocation3]  }
  0x19   :  { %s452_s7 = scalar_lea.vmem %s43_s28, 1024  ;;  %p457_p11 = scmp.lt.s32.totalorder %s43_s28, %s43_s28 }
  0x1a   :  { %p453_p10 = scmp.ne.s32.totalorder %s43_s28, %s452_s7  ;;  %p458_p12 = scmp.lt.s32.totalorder %s452_s7, %s452_s7 }
  0x1c   :  { %p459_p13 = por %p458_p12, %p457_p11 }
  0x1e   :  { %p460_p0 = pnand %p459_p13, %p453_p10 }
  0x20   :  { %463 = shalt.err (!%p460_p0)
}
  0x21   :  { %48 = dma.hbm_to_vmem [thread:$0]  %s549_s3, 1024, %s43_s28, [#allocation6], %s491_s21, %s491_s21, %s492_s22  }
  0x22   :  { %484 = dma.done.wait [#allocation3], 128  }
  0x23   :  { %485 = vsyncadd [#allocation3], 4294967168 }
  0x24   :  { %486 = dma.done.wait [#allocation6], 2048  }
  0x25   :  { %487 = vsyncadd [#allocation6], 4294965248  ;;  %v495_v0 = vmov 0.0   ;;  %vm496_vm0 = vmmov 0   ;;  %v388_v1 = vld [vmem:[#allocation5 + $0x38] sm:$0xff]   ;;  %v389_v2 = vld [vmem:[#allocation5 + $0x30] sm:$0xff]  }
  0x26   :  { %340 = vmatprep.subr.bf16.mxu0 %v495_v0  ;;  %356 = vmatprep.mubr.msk.bf16.mxu0 %vm496_vm0, %v495_v0  ;;  %v390_v3 = vld [vmem:[#allocation5 + $0x28] sm:$0xff]   ;;  %v396_v4 = vld [vmem:[#allocation7 + $0x38] sm:$0xff]   ;;  %v391_v5 = vld [vmem:[#allocation5 + $0x20] sm:$0xff]   ;;  %s497_s11 = smov [#allocation8]  }
  0x27   :  { %360 = vmatprep.subr.bf16.mxu1 %v495_v0  ;;  %376 = vmatprep.mubr.msk.bf16.mxu1 %vm496_vm0, %v495_v0  ;;  %v397_v6 = vld [vmem:[#allocation7 + $0x30] sm:$0xff]   ;;  %v392_v7 = vld [vmem:[#allocation5 + $0x18] sm:$0xff]   ;;  %v398_v8 = vld [vmem:[#allocation7 + $0x28] sm:$0xff]   ;;  %s294_s12 = sshll.u32 %s497_s11, 4  ;;  %s295_s12 = int_to_ptr.vmem [resolvable:$true] %s294_s12 }
  0x28   :  { %341 = vmatpush3.bf16.msra.mxu0 %v388_v1  ;;  %361 = vmatpush3.bf16.msra.mxu1 %v396_v4  ;;  %v393_v9 = vld [vmem:[#allocation5 + $0x10] sm:$0xff]   ;;  %v399_v10 = vld [vmem:[#allocation7 + $0x20] sm:$0xff]   ;;  %v394_v11 = vld [vmem:[#allocation5 + $0x8] sm:$0xff]   ;;  %p469_p2 = scmp.lt.s32.totalorder %s295_s12, %s295_s12 }
  0x29   :  { %342 = vmatprep.subr.bf16.mxu0 %v495_v0  ;;  %362 = vmatprep.subr.bf16.mxu1 %v495_v0  ;;  %v400_v12 = vld [vmem:[#allocation7 + $0x18] sm:$0xff]   ;;  %v395_v13 = vld [vmem:[#allocation5] sm:$0xff]   ;;  %v401_v15 = vld [vmem:[#allocation7 + $0x10] sm:$0xff]  }
  0x2a   :  { %v61_v14 = vld [vmem:[#allocation2] sm:$0xff]  ;;  %v402_v17 = vld [vmem:[#allocation7 + $0x8] sm:$0xff]   ;;  %v403_v18 = vld [vmem:[#allocation7] sm:$0xff]  }
  0x2b   :  { %v62_v16 = vpack.c.bf16 %v61_v14, %v61_v14  ;;  %v304_v19 = vld [vmem:[%s548_s2] ss:$0 sm:$0xff]  ;;  %s464_s2 = scalar_lea.vmem %s295_s12, 128 }
  0x2c   :  { %343 = vmatpush3.bf16.msra.mxu0 %v389_v2  ;;  %363 = vmatpush3.bf16.msra.mxu1 %v397_v6  ;;  %v313_v27 = vld [vmem:[%s550_s4] ss:$0 sm:$0xff]  ;;  %p465_p1 = scmp.ne.s32.totalorder %s295_s12, %s464_s2  ;;  %p470_p3 = scmp.lt.s32.totalorder %s464_s2, %s464_s2 }
  0x2d   :  { %344 = vmatprep.subr.bf16.mxu0 %v495_v0  ;;  %364 = vmatprep.subr.bf16.mxu1 %v495_v0 }
  0x2e   :  { %p471_p4 = por %p470_p3, %p469_p2 }
  0x30   :  { %345 = vmatpush3.bf16.msra.mxu0 %v390_v3  ;;  %365 = vmatpush3.bf16.msra.mxu1 %v398_v8  ;;  %p472_p5 = pnand %p471_p4, %p465_p1 }
  0x31   :  { %346 = vmatprep.subr.bf16.mxu0 %v495_v0  ;;  %366 = vmatprep.subr.bf16.mxu1 %v495_v0 }
  0x34   :  { %347 = vmatpush3.bf16.msra.mxu0 %v391_v5  ;;  %367 = vmatpush3.bf16.msra.mxu1 %v399_v10 }
  0x35   :  { %348 = vmatprep.subr.bf16.mxu0 %v495_v0  ;;  %368 = vmatprep.subr.bf16.mxu1 %v495_v0 }
  0x38   :  { %349 = vmatpush3.bf16.msra.mxu0 %v392_v7  ;;  %369 = vmatpush3.bf16.msra.mxu1 %v400_v12 }
  0x39   :  { %350 = vmatprep.subr.bf16.mxu0 %v495_v0  ;;  %370 = vmatprep.subr.bf16.mxu1 %v495_v0 }
  0x3c   :  { %351 = vmatpush3.bf16.msra.mxu0 %v393_v9  ;;  %371 = vmatpush3.bf16.msra.mxu1 %v401_v15 }
  0x3d   :  { %352 = vmatprep.subr.bf16.mxu0 %v495_v0  ;;  %372 = vmatprep.subr.bf16.mxu1 %v495_v0 }
  0x40   :  { %353 = vmatpush3.bf16.msra.mxu0 %v394_v11  ;;  %373 = vmatpush3.bf16.msra.mxu1 %v402_v17 }
  0x41   :  { %354 = vmatprep.subr.bf16.mxu0 %v495_v0  ;;  %374 = vmatprep.subr.bf16.mxu1 %v495_v0 }
  0x44   :  { %355 = vmatpush3.bf16.msra.mxu0 %v395_v13  ;;  %375 = vmatpush3.bf16.msra.mxu1 %v403_v18 }
  0x47   :  { %357 = vmatmul.mubr.bf16.vlgmr.msra.gmra.mxu0 %v62_v16 }
 0x107   :  { %v168_v20 = vpop.f32.mrf.mxu0 }
 0x108   :  { %v169_v21 = vadd.f32 %v304_v19, %v168_v20 }
 0x109   :  { %v358_v22 = vpop.f32.mrf.mxu0 }
 0x10a   :  { %v174_v23 = vmax.f32 %v169_v21, 0.0 }
 0x10b   :  { %v171_v24 = vpop.f32.mrf.mxu0 }
 0x10c   :  { %v175_v25 = vpack.c.bf16 %v174_v23, %v174_v23 }
 0x10d   :  { %v359_v26 = vpop.f32.mrf.mxu0 }
 0x10e   :  { %377 = vmatmul.mubr.bf16.vlgmr.msra.gmra.mxu1 %v175_v25 }
 0x1ce   :  { %v281_v28 = vpop.f32.mrf.mxu1 }
 0x1cf   :  { %v282_v29 = vadd.f32 %v313_v27, %v281_v28 }
 0x1d0   :  { %v378_v30 = vpop.f32.mrf.mxu1 }
 0x1d1   :  { %287 = vst [vmem:[#allocation8] sm:$0xff] %v282_v29 }
 0x1d2   :  { %v284_v31 = vpop.f32.mrf.mxu1 }
 0x1d3   :  { %475 = shalt.err (!%p472_p5)
}
 0x1d4   :  { %297 = dma.vmem_to_hbm [thread:$0]  %s295_s12, 128, %s551_s5, [#allocation4]   ;;  %v379_v32 = vpop.f32.mrf.mxu1 }
 0x1d5   :  { %488 = dma.done.wait [#allocation4], 128  }
 0x1d6   :  { %489 = vsyncadd [#allocation4], 4294967168 }
 0x1d7   :  { %301 = vsyncpa [#allocation3], 1 }
 0x1d8   :  { %302 = vsyncpa [#allocation6], 1 }
 0x1d9   :  { %303 = vsyncpa [#allocation4], 1 }

</bundles_post_ra>
